<compile_context>
chip_gen: v6e
topology: v6e:2x2x1
jax: 0.10.0
libtpu: 0.0.40
codegen_flags: <defaults>
</compile_context>

<pallas_src>
import functools

import jax
import jax.numpy as jnp
from jax import lax
from jax.experimental import pallas as pl
from jax.experimental.pallas import tpu as pltpu


def _conv_bn_lrelu_kernel(x_ref, w_ref, gamma_ref, beta_ref, o_ref,
                          *, n_imgs, h_img, cout, neg_slope, eps):
    # x_ref     : (N*Hp, Wp*Cin)   zero-padded input, one padded image row per row
    # w_ref     : (3*Wp*Cin, W*Cout)  banded conv weights (built once in wrapper)
    # gamma_ref : (1, W*Cout)      gamma tiled along lanes (lane = w*Cout + c)
    # beta_ref  : (1, W*Cout)      beta tiled along lanes
    # o_ref     : (N*H,  W*Cout)   lane-dense output
    hp = h_img + 2
    n_rows, wc = o_ref.shape                      # N*H, W*Cout

    x2 = x_ref[...]                               # (N*Hp, Wp*Cin), f32

    # Build the (N*H, 3*Wp*Cin) activation slab: for each vertical tap dy the H
    # valid rows of every image (contiguous sublane slices), concatenated along
    # lanes.  This replaces the 9 strided whole-input copies of the old kernel.
    dy_slabs = []
    for dy in range(3):
        rows = [x2[n * hp + dy: n * hp + dy + h_img, :] for n in range(n_imgs)]
        dy_slabs.append(rows[0] if n_imgs == 1 else jnp.concatenate(rows, axis=0))
    patches = jnp.concatenate(dy_slabs, axis=1)   # (N*H, 3*Wp*Cin)

    # --- 3x3 convolution as a single MXU matmul, f32 accumulation -------------
    acc = jnp.dot(patches, w_ref[...],
                  preferred_element_type=jnp.float32)        # (N*H, W*Cout)

    # --- BatchNorm2d, training-mode batch statistics, one pass ----------------
    # Lanes are laid out as w*Cout + c.  p_same[i, j] = 1 iff lanes i and j
    # belong to the same channel, so row_sums @ p_same gives every lane its own
    # channel's total (sum and sum-of-squares) without any reshape/transpose.
    p_same = (lax.broadcasted_iota(jnp.int32, (wc, wc), 0) % cout ==
              lax.broadcasted_iota(jnp.int32, (wc, wc), 1) % cout
              ).astype(jnp.float32)                          # (WC, WC)
    row_sums = jnp.concatenate(
        [jnp.sum(acc, axis=0, keepdims=True),
         jnp.sum(acc * acc, axis=0, keepdims=True)], axis=0)  # (2, WC)
    totals = jnp.dot(row_sums, p_same,
                     preferred_element_type=jnp.float32)      # (2, WC)

    cnt = float(n_rows * (wc // cout))                        # N*H*W per channel
    mean = totals[0:1, :] / cnt                               # (1, WC)
    var = totals[1:2, :] / cnt - mean * mean                  # biased, as PyTorch
    inv = lax.rsqrt(var + eps)

    scale = gamma_ref[...] * inv                              # (1, WC)
    shift = beta_ref[...] - mean * scale                      # (1, WC)

    y = acc * scale + shift                                   # BN affine
    y = jnp.where(y >= 0.0, y, neg_slope * y)                 # LeakyReLU(0.01)
    o_ref[...] = y.astype(o_ref.dtype)                        # lane-dense store


def concat_forward(x, skip, w_oihw, gamma, beta):
    """Forward of the PyTorch `Concat` module.

    x: (N, C1, H, W), skip: (N, C2, H, W), w_oihw: (Cout, C1+C2, 3, 3),
    gamma/beta: (Cout,).  Returns (N, Cout, H, W) float32.
    """
    N, C1, H, W = x.shape
    C2 = skip.shape[1]
    Cin = C1 + C2
    Cout = w_oihw.shape[0]
    Hp, Wp = H + 2, W + 2
    WpC = Wp * Cin
    WC = W * Cout

    # ---- glue (layout only): channel concat, NCHW->NHWC, zero pad, 2D fold ----
    x_nhwc = jnp.concatenate([jnp.transpose(x, (0, 2, 3, 1)),
                              jnp.transpose(skip, (0, 2, 3, 1))], axis=-1)
    x_pad = jnp.pad(x_nhwc, ((0, 0), (1, 1), (1, 1), (0, 0)))
    x2 = x_pad.reshape(N * Hp, WpC).astype(jnp.float32)       # (N*Hp, Wp*Cin)

    # ---- weight repack (once): 3x3 conv -> banded matmul weights --------------
    # w_big[(dy, wp, ci), (w, co)] = w[co, ci, dy, wp - w]  for 0 <= wp-w <= 2.
    w_k = jnp.transpose(w_oihw, (2, 3, 1, 0)).astype(jnp.float32)   # (ky,kx,ci,co)
    sel = (jnp.arange(Wp)[:, None, None] ==
           jnp.arange(W)[None, :, None] + jnp.arange(3)[None, None, :]
           ).astype(jnp.float32)                                     # (Wp, W, 3)
    w_big = jnp.einsum('pwx,yxio->ypiwo', sel, w_k).reshape(3 * WpC, WC)

    gamma_l = jnp.tile(gamma.astype(jnp.float32), W).reshape(1, WC)
    beta_l = jnp.tile(beta.astype(jnp.float32), W).reshape(1, WC)

    kernel = functools.partial(_conv_bn_lrelu_kernel,
                               n_imgs=N, h_img=H, cout=Cout,
                               neg_slope=0.01, eps=1e-5)

    vmem = pl.BlockSpec(memory_space=pltpu.MemorySpace.VMEM)
    # Single block, no grid: every operand is a few hundred KiB at these shapes.
    # For large N*H*W, tile the row axis with a BlockSpec grid and a two-phase
    # BN-stats design (pass 1: conv + per-tile sum/sumsq; pass 2: normalize).
    out2 = pl.pallas_call(
        kernel,
        out_shape=jax.ShapeDtypeStruct((N * H, WC), jnp.float32),
        in_specs=[vmem, vmem, vmem, vmem],
        out_specs=vmem,
    )(x2, w_big, gamma_l, beta_l)

    # lane-dense (N*H, W*Cout) -> NCHW
    return jnp.transpose(out2.reshape(N, H, W, Cout), (0, 3, 1, 2))


def reference(x, skip, w_oihw, gamma, beta):
    xcat = jnp.concatenate([x, skip], axis=1)
    conv = lax.conv_general_dilated(
        xcat, w_oihw, window_strides=(1, 1), padding=((1, 1), (1, 1)),
        dimension_numbers=("NCHW", "OIHW", "NCHW"),
        precision=lax.Precision.HIGHEST)
    mean = jnp.mean(conv, axis=(0, 2, 3), keepdims=True)
    var = jnp.mean((conv - mean) ** 2, axis=(0, 2, 3), keepdims=True)
    y = (conv - mean) * lax.rsqrt(var + 1e-5)
    y = y * gamma.reshape(1, -1, 1, 1) + beta.reshape(1, -1, 1, 1)
    return jnp.where(y >= 0.0, y, 0.01 * y)


if __name__ == "__main__":
    key = jax.random.PRNGKey(0)
    k_x, k_s, k_w, k_g, k_b = jax.random.split(key, 5)

    N, C1, C2, Cout, H, W = 2, 2, 2, 8, 16, 16
    x = jax.random.normal(k_x, (N, C1, H, W), dtype=jnp.float32)
    skip = jax.random.normal(k_s, (N, C2, H, W), dtype=jnp.float32)
    w = jax.random.normal(k_w, (Cout, C1 + C2, 3, 3), dtype=jnp.float32) * 0.1
    gamma = 1.0 + 0.1 * jax.random.normal(k_g, (Cout,), dtype=jnp.float32)
    beta = 0.1 * jax.random.normal(k_b, (Cout,), dtype=jnp.float32)

    fwd = jax.jit(concat_forward)
    out = jax.block_until_ready(fwd(x, skip, w, gamma, beta))

    ref = reference(x, skip, w, gamma, beta)
    assert out.shape == (N, Cout, H, W)
    err = float(jnp.max(jnp.abs(out - ref)))
    assert jnp.allclose(out, ref, atol=2e-4, rtol=2e-4), err

    print("KERNEL_OK")
</pallas_src>

<mosaic_0001>
module attributes {stable_mosaic.version = 11 : i64} {
  func.func @_conv_bn_lrelu_kernel(%arg0: memref<36x72xf32, #tpu.memory_space<vmem>>, %arg1: memref<216x128xf32, #tpu.memory_space<vmem>>, %arg2: memref<1x128xf32, #tpu.memory_space<vmem>>, %arg3: memref<1x128xf32, #tpu.memory_space<vmem>>, %arg4: memref<32x128xf32, #tpu.memory_space<vmem>>) attributes {dimension_semantics = [], scalar_prefetch = 0 : i64, scratch_operands = 0 : i64, tpu.core_type = #tpu.core_type<tc>} {
    %c0 = arith.constant 0 : index
    %c0_0 = arith.constant 0 : index
    %0 = vector.load %arg0[%c0, %c0_0] : memref<36x72xf32, #tpu.memory_space<vmem>>, vector<36x72xf32>
    %1 = vector.extract_strided_slice %0 {offsets = [0, 0], sizes = [16, 72], strides = [1, 1]} : vector<36x72xf32> to vector<16x72xf32>
    %2 = vector.extract_strided_slice %0 {offsets = [18, 0], sizes = [16, 72], strides = [1, 1]} : vector<36x72xf32> to vector<16x72xf32>
    %3 = tpu.concatenate %1, %2 in 0 : vector<16x72xf32>, vector<16x72xf32> -> vector<32x72xf32>
    %4 = vector.extract_strided_slice %0 {offsets = [1, 0], sizes = [16, 72], strides = [1, 1]} : vector<36x72xf32> to vector<16x72xf32>
    %5 = vector.extract_strided_slice %0 {offsets = [19, 0], sizes = [16, 72], strides = [1, 1]} : vector<36x72xf32> to vector<16x72xf32>
    %6 = tpu.concatenate %4, %5 in 0 : vector<16x72xf32>, vector<16x72xf32> -> vector<32x72xf32>
    %7 = vector.extract_strided_slice %0 {offsets = [2, 0], sizes = [16, 72], strides = [1, 1]} : vector<36x72xf32> to vector<16x72xf32>
    %8 = vector.extract_strided_slice %0 {offsets = [20, 0], sizes = [16, 72], strides = [1, 1]} : vector<36x72xf32> to vector<16x72xf32>
    %9 = tpu.concatenate %7, %8 in 0 : vector<16x72xf32>, vector<16x72xf32> -> vector<32x72xf32>
    %10 = tpu.concatenate %3, %6, %9 in 1 : vector<32x72xf32>, vector<32x72xf32>, vector<32x72xf32> -> vector<32x216xf32>
    %c0_1 = arith.constant 0 : index
    %c0_2 = arith.constant 0 : index
    %11 = vector.load %arg1[%c0_1, %c0_2] : memref<216x128xf32, #tpu.memory_space<vmem>>, vector<216x128xf32>
    %cst = arith.constant dense<0.000000e+00> : vector<32x128xf32>
    %12 = tpu.matmul %10, %11, %cst {dimension_numbers = #tpu.dot_dimension_numbers<[1], [0], [0], [1], [0, 0, 1, 1], [], []>} : vector<32x216xf32>, vector<216x128xf32>, vector<32x128xf32> -> vector<32x128xf32>
    %13 = tpu.iota {dimensions = array<i32: 0>} : vector<128x128xi32>
    %c8_i32 = arith.constant 8 : i32
    %c0_i32 = arith.constant 0 : i32
    %14 = arith.cmpi eq, %c8_i32, %c0_i32 : i32
    %c1_i32 = arith.constant 1 : i32
    %15 = arith.select %14, %c1_i32, %c8_i32 : i32
    %16 = vector.broadcast %15 : i32 to vector<128x128xi32>
    %17 = arith.remsi %13, %16 : vector<128x128xi32>
    %c0_i32_3 = arith.constant 0 : i32
    %18 = vector.broadcast %c0_i32_3 : i32 to vector<128x128xi32>
    %19 = arith.cmpi ne, %17, %18 : vector<128x128xi32>
    %c0_i32_4 = arith.constant 0 : i32
    %20 = vector.broadcast %c0_i32_4 : i32 to vector<128x128xi32>
    %21 = arith.cmpi slt, %17, %20 : vector<128x128xi32>
    %c0_i32_5 = arith.constant 0 : i32
    %22 = arith.cmpi slt, %15, %c0_i32_5 : i32
    %23 = vector.broadcast %22 : i1 to vector<128x128xi1>
    %24 = vector.broadcast %23 : vector<128x128xi1> to vector<128x128xi1>
    %25 = arith.xori %21, %24 : vector<128x128xi1>
    %26 = arith.andi %25, %19 : vector<128x128xi1>
    %27 = vector.broadcast %15 : i32 to vector<128x128xi32>
    %28 = arith.addi %17, %27 : vector<128x128xi32>
    %29 = arith.select %26, %28, %17 : vector<128x128xi1>, vector<128x128xi32>
    %30 = tpu.iota {dimensions = array<i32: 1>} : vector<128x128xi32>
    %c8_i32_6 = arith.constant 8 : i32
    %c0_i32_7 = arith.constant 0 : i32
    %31 = arith.cmpi eq, %c8_i32_6, %c0_i32_7 : i32
    %c1_i32_8 = arith.constant 1 : i32
    %32 = arith.select %31, %c1_i32_8, %c8_i32_6 : i32
    %33 = vector.broadcast %32 : i32 to vector<128x128xi32>
    %34 = arith.remsi %30, %33 : vector<128x128xi32>
    %c0_i32_9 = arith.constant 0 : i32
    %35 = vector.broadcast %c0_i32_9 : i32 to vector<128x128xi32>
    %36 = arith.cmpi ne, %34, %35 : vector<128x128xi32>
    %c0_i32_10 = arith.constant 0 : i32
    %37 = vector.broadcast %c0_i32_10 : i32 to vector<128x128xi32>
    %38 = arith.cmpi slt, %34, %37 : vector<128x128xi32>
    %c0_i32_11 = arith.constant 0 : i32
    %39 = arith.cmpi slt, %32, %c0_i32_11 : i32
    %40 = vector.broadcast %39 : i1 to vector<128x128xi1>
    %41 = vector.broadcast %40 : vector<128x128xi1> to vector<128x128xi1>
    %42 = arith.xori %38, %41 : vector<128x128xi1>
    %43 = arith.andi %42, %36 : vector<128x128xi1>
    %44 = vector.broadcast %32 : i32 to vector<128x128xi32>
    %45 = arith.addi %34, %44 : vector<128x128xi32>
    %46 = arith.select %43, %45, %34 : vector<128x128xi1>, vector<128x128xi32>
    %47 = arith.cmpi eq, %29, %46 : vector<128x128xi32>
    %48 = arith.extui %47 : vector<128x128xi1> to vector<128x128xi32>
    %49 = arith.sitofp %48 : vector<128x128xi32> to vector<128x128xf32>
    %cst_12 = arith.constant dense<0.000000e+00> : vector<128xf32>
    %50 = vector.multi_reduction <add>, %12, %cst_12 [0] : vector<32x128xf32> to vector<128xf32>
    %51 = vector.shape_cast %50 : vector<128xf32> to vector<1x128xf32>
    %52 = arith.mulf %12, %12 : vector<32x128xf32>
    %cst_13 = arith.constant dense<0.000000e+00> : vector<128xf32>
    %53 = vector.multi_reduction <add>, %52, %cst_13 [0] : vector<32x128xf32> to vector<128xf32>
    %54 = vector.shape_cast %53 : vector<128xf32> to vector<1x128xf32>
    %55 = tpu.concatenate %51, %54 in 0 : vector<1x128xf32>, vector<1x128xf32> -> vector<2x128xf32>
    %cst_14 = arith.constant dense<0.000000e+00> : vector<2x128xf32>
    %56 = tpu.matmul %55, %49, %cst_14 {dimension_numbers = #tpu.dot_dimension_numbers<[1], [0], [0], [1], [0, 0, 1, 1], [], []>} : vector<2x128xf32>, vector<128x128xf32>, vector<2x128xf32> -> vector<2x128xf32>
    %57 = vector.extract_strided_slice %56 {offsets = [0, 0], sizes = [1, 128], strides = [1, 1]} : vector<2x128xf32> to vector<1x128xf32>
    %cst_15 = arith.constant 5.120000e+02 : f32
    %58 = vector.broadcast %cst_15 : f32 to vector<1x128xf32>
    %59 = arith.divf %57, %58 : vector<1x128xf32>
    %60 = vector.extract_strided_slice %56 {offsets = [1, 0], sizes = [1, 128], strides = [1, 1]} : vector<2x128xf32> to vector<1x128xf32>
    %cst_16 = arith.constant 5.120000e+02 : f32
    %61 = vector.broadcast %cst_16 : f32 to vector<1x128xf32>
    %62 = arith.divf %60, %61 : vector<1x128xf32>
    %63 = arith.mulf %59, %59 : vector<1x128xf32>
    %64 = arith.subf %62, %63 : vector<1x128xf32>
    %cst_17 = arith.constant 9.99999974E-6 : f32
    %65 = vector.broadcast %cst_17 : f32 to vector<1x128xf32>
    %66 = arith.addf %64, %65 : vector<1x128xf32>
    %67 = math.rsqrt %66 : vector<1x128xf32>
    %c0_18 = arith.constant 0 : index
    %c0_19 = arith.constant 0 : index
    %68 = vector.load %arg2[%c0_18, %c0_19] : memref<1x128xf32, #tpu.memory_space<vmem>>, vector<1x128xf32>
    %69 = arith.mulf %68, %67 : vector<1x128xf32>
    %c0_20 = arith.constant 0 : index
    %c0_21 = arith.constant 0 : index
    %70 = vector.load %arg3[%c0_20, %c0_21] : memref<1x128xf32, #tpu.memory_space<vmem>>, vector<1x128xf32>
    %71 = arith.mulf %59, %69 : vector<1x128xf32>
    %72 = arith.subf %70, %71 : vector<1x128xf32>
    %73 = vector.broadcast %69 : vector<1x128xf32> to vector<32x128xf32>
    %74 = arith.mulf %12, %73 : vector<32x128xf32>
    %75 = vector.broadcast %72 : vector<1x128xf32> to vector<32x128xf32>
    %76 = arith.addf %74, %75 : vector<32x128xf32>
    %cst_22 = arith.constant 0.000000e+00 : f32
    %77 = vector.broadcast %cst_22 : f32 to vector<32x128xf32>
    %78 = arith.cmpf oge, %76, %77 : vector<32x128xf32>
    %cst_23 = arith.constant 0.00999999977 : f32
    %79 = vector.broadcast %cst_23 : f32 to vector<32x128xf32>
    %80 = arith.mulf %79, %76 : vector<32x128xf32>
    %81 = arith.select %78, %76, %80 : vector<32x128xi1>, vector<32x128xf32>
    %c0_24 = arith.constant 0 : index
    %c0_25 = arith.constant 0 : index
    %82 = vector.load %arg4[%c0_24, %c0_25] : memref<32x128xf32, #tpu.memory_space<vmem>>, vector<32x128xf32>
    tpu.vector_store %arg4[%c0_24, %c0_25], %81 {strides = array<i32>} : memref<32x128xf32, #tpu.memory_space<vmem>>, vector<32x128xf32>,
    return
  }
}

</mosaic_0001>

<bundles_post_ra>
// kernel: tile.13
= control target key start
LH: loop header
LB: loop body
LE: loop exit
PB: predicated region body
PF: predicated region fallthrough
CT: control target
= control target key end

     0   :  { %s28_s0 = inlined_call_operand.vmem [shape: f32[8], index: 0, kind: input, shape index: {}]   ;;  %s29_s1 = inlined_call_operand.vmem [shape: f32[16,8], index: 1, kind: output, shape index: {}]  }
   0x1   :  { %v4_v0 = vld [vmem:[%s28_s0] ss:$0 sm:$0xff] }
   0x2   :  { %5 = vst [vmem:[%s29_s1] sm:$0xff] %v4_v0  ;;  %8 = vst [vmem:[%s29_s1 + $0x8] sm:$0xff] %v4_v0 }

// kernel: tile.14
= control target key start
LH: loop header
LB: loop body
LE: loop exit
PB: predicated region body
PF: predicated region fallthrough
CT: control target
= control target key end

     0   :  { %s133_s10 = smov 120   ;;  %s134_s11 = smov 104   ;;  %vm3_vm0 = vcmask 64512   ;;  %vm9_vm1 = vcmask 1048512   ;;  %vm15_vm2 = vcmask 982912   ;;  %vm21_vm3 = vcmask 917312   ;;  %s209_s0 = inlined_call_operand.vmem [shape: f32[16,8], index: 0, kind: input, shape index: {}]   ;;  %s210_s1 = inlined_call_operand.vmem [shape: f32[1,128], index: 1, kind: output, shape index: {}]  }
   0x1   :  { %v103_v0 = vld [vmem:[%s209_s0 + $0xf] sm:$0x1]   ;;  %v105_v1 = vld [vmem:[%s209_s0 + $0xd] sm:$0x1]   ;;  %v104_v2 = vld [vmem:[%s209_s0 + $0xe] sm:$0x1]  }
   0x2   :  { %7 = vrot.lane.b32.xlu0 %v103_v0, %s133_s10  ;;  %19 = vrot.lane.b32.xlu1 %v105_v1, %s134_s11  ;;  %v106_v3 = vld [vmem:[%s209_s0 + $0xc] sm:$0x1]   ;;  %s135_s16 = smov 112   ;;  %s136_s17 = smov 96   ;;  %v107_v4 = vld [vmem:[%s209_s0 + $0xb] sm:$0x1]  }
   0x3   :  { %v108_v5 = vld [vmem:[%s209_s0 + $0xa] sm:$0x1]   ;;  %v2_v6 = vld [vmem:[%s209_s0] sm:$0x1]   ;;  %s137_s24 = smov 88   ;;  %s138_s25 = smov 80  }
   0x4   :  { %4 = vst.msk [vmem:[#allocation0] sm:$0x1] %vm3_vm0, %v2_v6   ;;  %v109_v7 = vld [vmem:[%s209_s0 + $0x9] sm:$0x1]   ;;  %v110_v8 = vld [vmem:[%s209_s0 + $0x8] sm:$0x1]  }
   0x5   :  { %s139_s30 = smov 72   ;;  %s140_s2 = smov 64   ;;  %v111_v9 = vld [vmem:[%s209_s0 + $0x7] sm:$0x1]   ;;  %v112_v10 = vld [vmem:[%s209_s0 + $0x6] sm:$0x1]  }
   0x6   :  { %13 = vrot.lane.b32.xlu0 %v104_v2, %s135_s16  ;;  %25 = vrot.lane.b32.xlu1 %v106_v3, %s136_s17  ;;  %s141_s7 = smov 56   ;;  %s142_s8 = smov 48   ;;  %v113_v11 = vld [vmem:[%s209_s0 + $0x5] sm:$0x1]   ;;  %v114_v12 = vld [vmem:[%s209_s0 + $0x4] sm:$0x1]  }
   0x7   :  { %s143_s13 = smov 40   ;;  %s144_s14 = smov 32   ;;  %v115_v13 = vld [vmem:[%s209_s0 + $0x3] sm:$0x1]   ;;  %v116_v14 = vld [vmem:[%s209_s0 + $0x2] sm:$0x1]  }
   0x8   :  { %s145_s19 = smov 24   ;;  %s146_s20 = smov 16   ;;  %v117_v15 = vld [vmem:[%s209_s0 + $0x1] sm:$0x1]   ;;  %vm27_vm4 = vcmask 851712   ;;  %vm33_vm5 = vcmask 786112  }
   0x9   :  { %s147_s0 = smov 8   ;;  %vm39_vm6 = vcmask 720512   ;;  %vm45_vm7 = vcmask 654912   ;;  %vm51_vm8 = vcmask 589312   ;;  %vm57_vm9 = vcmask 523712  }
   0xa   :  { %31 = vrot.lane.b32.xlu0 %v107_v4, %s137_s24  ;;  %37 = vrot.lane.b32.xlu1 %v108_v5, %s138_s25  ;;  %vm63_vm10 = vcmask 458112   ;;  %vm69_vm11 = vcmask 392512   ;;  %vm75_vm12 = vcmask 326912   ;;  %vm81_vm13 = vcmask 261312  }
   0xb   :  { %vm87_vm14 = vcmask 195712   ;;  %vm93_vm15 = vcmask 130112  }
   0xe   :  { %43 = vrot.lane.b32.xlu0 %v109_v7, %s139_s30  ;;  %49 = vrot.lane.b32.xlu1 %v110_v8, %s140_s2 }
  0x12   :  { %55 = vrot.lane.b32.xlu0 %v111_v9, %s141_s7  ;;  %61 = vrot.lane.b32.xlu1 %v112_v10, %s142_s8 }
  0x16   :  { %67 = vrot.lane.b32.xlu0 %v113_v11, %s143_s13  ;;  %73 = vrot.lane.b32.xlu1 %v114_v12, %s144_s14 }
  0x1a   :  { %79 = vrot.lane.b32.xlu0 %v115_v13, %s145_s19  ;;  %85 = vrot.lane.b32.xlu1 %v116_v14, %s146_s20 }
  0x1e   :  { %91 = vrot.lane.b32.xlu0 %v117_v15, %s147_s0 }
  0x74   :  { %v8_v16 = vpop.permute.xlu0 %7   ;;  %v20_v17 = vpop.permute.xlu1 %19  }
  0x75   :  { %10 = vst.msk [vmem:[#allocation0] sm:$0x1] %vm9_vm1, %v8_v16  }
  0x78   :  { %v14_v18 = vpop.permute.xlu0 %13   ;;  %v26_v19 = vpop.permute.xlu1 %25  }
  0x79   :  { %16 = vst.msk [vmem:[#allocation0] sm:$0x1] %vm15_vm2, %v14_v18  }
  0x7a   :  { %22 = vst.msk [vmem:[#allocation0] sm:$0x1] %vm21_vm3, %v20_v17  }
  0x7b   :  { %28 = vst.msk [vmem:[#allocation0] sm:$0x1] %vm27_vm4, %v26_v19  }
  0x7c   :  { %v32_v20 = vpop.permute.xlu0 %31   ;;  %v38_v21 = vpop.permute.xlu1 %37  }
  0x7d   :  { %34 = vst.msk [vmem:[#allocation0] sm:$0x1] %vm33_vm5, %v32_v20  }
  0x7e   :  { %40 = vst.msk [vmem:[#allocation0] sm:$0x1] %vm39_vm6, %v38_v21  }
  0x80   :  { %v44_v22 = vpop.permute.xlu0 %43   ;;  %v50_v23 = vpop.permute.xlu1 %49  }
  0x81   :  { %46 = vst.msk [vmem:[#allocation0] sm:$0x1] %vm45_vm7, %v44_v22  }
  0x82   :  { %52 = vst.msk [vmem:[#allocation0] sm:$0x1] %vm51_vm8, %v50_v23  }
  0x84   :  { %v56_v24 = vpop.permute.xlu0 %55   ;;  %v62_v25 = vpop.permute.xlu1 %61  }
  0x85   :  { %58 = vst.msk [vmem:[#allocation0] sm:$0x1] %vm57_vm9, %v56_v24  }
  0x86   :  { %64 = vst.msk [vmem:[#allocation0] sm:$0x1] %vm63_vm10, %v62_v25  }
  0x88   :  { %v68_v26 = vpop.permute.xlu0 %67   ;;  %v74_v27 = vpop.permute.xlu1 %73  }
  0x89   :  { %70 = vst.msk [vmem:[#allocation0] sm:$0x1] %vm69_vm11, %v68_v26  }
  0x8a   :  { %76 = vst.msk [vmem:[#allocation0] sm:$0x1] %vm75_vm12, %v74_v27  }
  0x8c   :  { %v80_v28 = vpop.permute.xlu0 %79   ;;  %v86_v29 = vpop.permute.xlu1 %85  }
  0x8d   :  { %82 = vst.msk [vmem:[#allocation0] sm:$0x1] %vm81_vm13, %v80_v28  }
  0x8e   :  { %88 = vst.msk [vmem:[#allocation0] sm:$0x1] %vm87_vm14, %v86_v29  }
  0x90   :  { %v92_v30 = vpop.permute.xlu0 %91  }
  0x91   :  { %94 = vst.msk [vmem:[#allocation0] sm:$0x1] %vm93_vm15, %v92_v30  }
  0x98   :  { %v99_v31 = vld [vmem:[#allocation0] sm:$0x1] }
  0x99   :  { %102 = vst [vmem:[%s210_s1] sm:$0x1] %v99_v31 }

// kernel: concat_forward.1
= control target key start
LH: loop header
LB: loop body
LE: loop exit
PB: predicated region body
PF: predicated region fallthrough
CT: control target
= control target key end

     0   :  { %vm35_vm0 = vcmask 1046528   ;;  %v748_v8 = vmov 0.0   ;;  %vm25_vm1 = vcmask 1045504   ;;  %s749_s27 = smov 72   ;;  %vm51_vm2 = vcmask 1043456   ;;  %s750_s8 = smov 16   ;;  %s1033_s0 = inlined_call_operand.vmem [shape: f32[36,72], index: 0, kind: input, shape index: {}]   ;;  %s1034_s1 = inlined_call_operand.vmem [shape: f32[216,128], index: 1, kind: input, shape index: {}]   ;;  %s1035_s2 = inlined_call_operand.vmem [shape: f32[1,128], index: 2, kind: input, shape index: {}]   ;;  %s1036_s3 = inlined_call_operand.vmem [shape: f32[1,128], index: 3, kind: input, shape index: {}]   ;;  %s1037_s4 = inlined_call_operand.vmem [shape: f32[32,128], index: 4, kind: output, shape index: {}]  }
   0x1   :  { %v782_v0 = vld [vmem:[%s1033_s0 + $0x8] sm:$0xff]  ;;  %v19_v1 = vld [vmem:[%s1033_s0 + $0x10] sm:$0xff]  ;;  %v790_v2 = vld [vmem:[%s1033_s0] sm:$0xff]  ;;  %131 = vmatprep.subr.mxu0 %v748_v8  ;;  %705 = vmatprep.subr.mxu1 %v748_v8  ;;  %vm41_vm3 = vcmask 1044480   ;;  %v216_v32 = vlaneseq  ;;  %v751_v44 = vmov 1.0   ;;  %vm86_vm5 = vcmask 130048  }
   0x2   :  { %v37_v3 = vrot.slane %v782_v0, 1  ;;  %v39_v4 = vrot.slane %v19_v1, 1  ;;  %v36_v5 = vrot.slane %v790_v2, 1  ;;  %v26_v6 = vrot.slane %v19_v1, 2  ;;  %v20_v7 = vld [vmem:[%s1033_s0 + $0x18] sm:$0xff]  ;;  %v105_v14 = vld [vmem:[%s1034_s1 + $0x70] sm:$0xff] }
   0x3   :  { %v106_v9 = vld [vmem:[%s1034_s1 + $0x78] sm:$0xff]  ;;  %v48_v10 = vrot.slane %v782_v0, 2  ;;  %v47_v11 = vrot.slane %v790_v2, 2  ;;  %v52_v15 = vrot.slane %v19_v1, 4  ;;  %v53_v16 = vrot.slane %v20_v7, 4  ;;  %v104_v18 = vld [vmem:[%s1034_s1 + $0x68] sm:$0xff] }
   0x4   :  { %132 = vmatpush1.msra.mxu0 %v106_v9  ;;  %v40_v12 = vsel %vm35_vm0, %v37_v3, %v39_v4  ;;  %v38_v13 = vsel %vm35_vm0, %v36_v5, %v37_v3  ;;  %v42_v17 = vrot.slane %v19_v1, 3  ;;  %v43_v21 = vrot.slane %v20_v7, 3  ;;  %v21_v22 = vld [vmem:[%s1033_s0 + $0x20] sm:$0xf]  ;;  %v102_v33 = vld [vmem:[%s1034_s1 + $0x58] sm:$0xff]  ;;  %v101_v36 = vld [vmem:[%s1034_s1 + $0x50] sm:$0xff] }
   0x5   :  { %133 = vmatprep.subr.mxu0 %v748_v8  ;;  %59 = vrot.lane.b32.xlu1 %v40_v12, %s749_s27  ;;  %v50_v19 = vsel %vm25_vm1, %v48_v10, %v26_v6  ;;  %v49_v20 = vsel %vm25_vm1, %v47_v11, %v48_v10  ;;  %v27_v23 = vrot.slane %v20_v7, 2  ;;  %v29_v24 = vrot.slane %v21_v22, 2  ;;  %v103_v25 = vld [vmem:[%s1034_s1 + $0x60] sm:$0xff]  ;;  %v100_v41 = vld [vmem:[%s1034_s1 + $0x48] sm:$0xff]  ;;  %v98_v45 = vld [vmem:[%s1034_s1 + $0x38] sm:$0xff] }
   0x6   :  { %57 = vrot.lane.b32.xlu0 %v38_v13, %s749_s27  ;;  %134 = vmatpush1.msra.mxu0 %v105_v14  ;;  %v54_v27 = vsel %vm51_vm2, %v52_v15, %v53_v16  ;;  %v44_v29 = vsel %vm41_vm3, %v42_v17, %v43_v21  ;;  %v55_v30 = vrot.slane %v21_v22, 4  ;;  %v45_v31 = vrot.slane %v21_v22, 3  ;;  %v99_v43 = vld [vmem:[%s1034_s1 + $0x40] sm:$0xff]  ;;  %v97_v46 = vld [vmem:[%s1034_s1 + $0x30] sm:$0xff]  ;;  %v96_v47 = vld [vmem:[%s1034_s1 + $0x28] sm:$0xff] }
   0x7   :  { %135 = vmatprep.subr.mxu0 %v748_v8  ;;  %v825_v26 = vsel %vm25_vm1, %v26_v6, %v27_v23  ;;  %v829_v28 = vsel %vm25_vm1, %v27_v23, %v29_v24  ;;  %v837_v34 = vshrl.u32 %v216_v32, 7  ;;  %v426_v35 = vand.u32 127, %v216_v32  ;;  %v95_v48 = vld [vmem:[%s1034_s1 + $0x20] sm:$0xff]  ;;  %v94_v49 = vld [vmem:[%s1034_s1 + $0x18] sm:$0xff]  ;;  %v93_v50 = vld [vmem:[%s1034_s1 + $0x10] sm:$0xff] }
   0x8   :  { %136 = vmatpush1.msra.mxu0 %v104_v18  ;;  %v56_v37 = vsel %vm51_vm2, %v53_v16, %v55_v30  ;;  %v46_v38 = vsel %vm41_vm3, %v43_v21, %v45_v31  ;;  %v92_v51 = vld [vmem:[%s1034_s1 + $0x8] sm:$0xff]  ;;  %v91_v52 = vld [vmem:[%s1034_s1] sm:$0xff]  ;;  %v117_v53 = vld [vmem:[%s1034_s1 + $0xd0] sm:$0xff]  ;;  %vm118_vm6 = vcmask 719872   ;;  %vm81_vm7 = vcmask 588800  }
   0x9   :  { %71 = vrot.lane.b32.xlu1 %v50_v19, %s750_s8  ;;  %137 = vmatprep.subr.mxu0 %v748_v8  ;;  %v232_v39 = vadd.s32 120, %v837_v34  ;;  %v846_v40 = vand.u32 7, %v426_v35  ;;  %v116_v54 = vld [vmem:[%s1034_s1 + $0xc8] sm:$0xff]  ;;  %v115_v55 = vld [vmem:[%s1034_s1 + $0xc0] sm:$0xff]  ;;  %v114_v56 = vld [vmem:[%s1034_s1 + $0xb8] sm:$0xff]  ;;  %v231_v18 = vadd.s32 112, %v837_v34 }
   0xa   :  { %69 = vrot.lane.b32.xlu0 %v49_v20, %s750_s8  ;;  %138 = vmatpush1.msra.mxu0 %v103_v25  ;;  %v113_v57 = vld [vmem:[%s1034_s1 + $0xb0] sm:$0xff]  ;;  %v112_v58 = vld [vmem:[%s1034_s1 + $0xa8] sm:$0xff]  ;;  %v111_v59 = vld [vmem:[%s1034_s1 + $0xa0] sm:$0xff]  ;;  %v230_v19 = vadd.s32 104, %v837_v34  ;;  %v229_v21 = vadd.s32 96, %v837_v34  ;;  %v228_v23 = vadd.s32 88, %v837_v34 }
   0xb   :  { %139 = vmatprep.subr.mxu0 %v748_v8  ;;  %v342_v42 = vand.u32 7, %v232_v39  ;;  %v110_v60 = vld [vmem:[%s1034_s1 + $0x98] sm:$0xff]  ;;  %v109_v61 = vld [vmem:[%s1034_s1 + $0x90] sm:$0xff]  ;;  %v108_v62 = vld [vmem:[%s1034_s1 + $0x88] sm:$0xff]  ;;  %v227_v25 = vadd.s32 80, %v837_v34  ;;  %v224_v31 = vadd.s32 56, %v837_v34 }
   0xc   :  { %140 = vmatpush1.msra.mxu0 %v102_v33  ;;  %v107_v63 = vld [vmem:[%s1034_s1 + $0x80] sm:$0xff]  ;;  %v328_v20 = vand.u32 7, %v230_v19  ;;  %v321_v22 = vand.u32 7, %v229_v21  ;;  %v314_v24 = vand.u32 7, %v228_v23  ;;  %v223_v33 = vadd.s32 48, %v837_v34 }
   0xd   :  { %73 = vrot.lane.b32.xlu1 %v54_v27, %s750_s8  ;;  %141 = vmatprep.subr.mxu0 %v748_v8  ;;  %vm454_vm4 = vcmp.eq.s32.totalorder %v342_v42, %v846_v40  ;;  %v226_v27 = vadd.s32 72, %v837_v34  ;;  %v286_v32 = vand.u32 7, %v224_v31  ;;  %v753_v21 = vmov 1966171168  }
   0xe   :  { %61 = vrot.lane.b32.xlu0 %v44_v29, %s749_s27  ;;  %142 = vmatpush1.msra.mxu0 %v101_v36  ;;  %vm452_vm9 = vcmp.eq.s32.totalorder %v328_v20, %v846_v40  ;;  %vm451_vm10 = vcmp.eq.s32.totalorder %v321_v22, %v846_v40  ;;  %vm450_vm11 = vcmp.eq.s32.totalorder %v314_v24, %v846_v40  ;;  %v225_v29 = vadd.s32 64, %v837_v34 }
   0xf   :  { %143 = vmatprep.subr.mxu0 %v748_v8  ;;  %706 = vmatpush3.msk.msra.mxu1 %vm454_vm4, %v751_v44  ;;  %vm446_vm15 = vcmp.eq.s32.totalorder %v286_v32, %v846_v40  ;;  %v279_v35 = vand.u32 7, %v223_v33  ;;  %v222_v36 = vadd.s32 40, %v837_v34  ;;  %vm752_vm4 = vmmov 0   ;;  %v609_v32 = vld [vmem:[%s1036_s3] sm:$0x1] }
  0x10   :  { %144 = vmatpush1.msra.mxu0 %v100_v41  ;;  %707 = vmatprep.subr.mxu1 %v748_v8  ;;  %v293_v30 = vand.u32 7, %v225_v29  ;;  %v220_v41 = vadd.s32 24, %v837_v34  ;;  %v593_v22 = vunpack.c.l.s4 %v753_v21 }
  0x11   :  { %75 = vrot.lane.b32.xlu1 %v56_v37, %s750_s8  ;;  %145 = vmatprep.subr.mxu0 %v748_v8  ;;  %vm445_vm0 = vcmp.eq.s32.totalorder %v279_v35, %v846_v40  ;;  %v272_v37 = vand.u32 7, %v222_v36 }
  0x12   :  { %63 = vrot.lane.b32.xlu0 %v46_v38, %s749_s27  ;;  %146 = vmatpush1.msra.mxu0 %v99_v43  ;;  %vm447_vm14 = vcmp.eq.s32.totalorder %v293_v30, %v846_v40  ;;  %v221_v38 = vadd.s32 32, %v837_v34  ;;  %v258_v42 = vand.u32 7, %v220_v41  ;;  %v219_v43 = vadd.s32 16, %v837_v34 }
  0x13   :  { %147 = vmatprep.subr.mxu0 %v748_v8  ;;  %vm444_vm1 = vcmp.eq.s32.totalorder %v272_v37, %v846_v40  ;;  %737 = vmatprep.mubr.msk.f32.mxu1 %vm752_vm4, %v748_v8  ;;  %v594_v23 = vunpack.c.0.s8 %v593_v22  ;;  %v615_v30 = vsub.s32 0, %v837_v34 }
  0x14   :  { %148 = vmatpush1.msra.mxu0 %v98_v45  ;;  %v265_v39 = vand.u32 7, %v221_v38  ;;  %v218_v45 = vadd.s32 8, %v837_v34  ;;  %vm442_vm3 = vcmp.eq.s32.totalorder %v258_v42, %v846_v40 }
  0x15   :  { %149 = vmatprep.subr.mxu0 %v748_v8  ;;  %v597_v24 = vsub.s32 %v594_v23, %v837_v34 }
  0x16   :  { %150 = vmatpush1.msra.mxu0 %v97_v46  ;;  %vm443_vm2 = vcmp.eq.s32.totalorder %v265_v39, %v846_v40  ;;  %v251_v46 = vand.u32 7, %v219_v43 }
  0x17   :  { %151 = vmatprep.subr.mxu0 %v748_v8 }
  0x18   :  { %152 = vmatpush1.msra.mxu0 %v96_v47  ;;  %v237_v47 = vand.u32 7, %v837_v34 }
  0x19   :  { %153 = vmatprep.subr.mxu0 %v748_v8 }
  0x1a   :  { %154 = vmatpush1.msra.mxu0 %v95_v48  ;;  %v244_v48 = vand.u32 7, %v218_v45 }
  0x1b   :  { %155 = vmatprep.subr.mxu0 %v748_v8 }
  0x1c   :  { %156 = vmatpush1.msra.mxu0 %v94_v49 }
  0x1d   :  { %157 = vmatprep.subr.mxu0 %v748_v8 }
  0x1e   :  { %158 = vmatpush1.msra.mxu0 %v93_v50 }
  0x1f   :  { %159 = vmatprep.subr.mxu0 %v748_v8 }
  0x20   :  { %160 = vmatpush1.msra.mxu0 %v92_v51 }
  0x21   :  { %161 = vmatprep.subr.mxu0 %v748_v8 }
  0x22   :  { %162 = vmatpush1.msra.mxu0 %v91_v52 }
  0x23   :  { %173 = vmatprep.subr.mxu0 %v748_v8 }
  0x24   :  { %174 = vmatpush2.msra.mxu0 %v117_v53 }
  0x25   :  { %175 = vmatprep.subr.mxu0 %v748_v8 }
  0x26   :  { %176 = vmatpush2.msra.mxu0 %v116_v54 }
  0x27   :  { %177 = vmatprep.subr.mxu0 %v748_v8 }
  0x28   :  { %178 = vmatpush2.msra.mxu0 %v115_v55 }
  0x29   :  { %179 = vmatprep.subr.mxu0 %v748_v8 }
  0x2a   :  { %180 = vmatpush2.msra.mxu0 %v114_v56 }
  0x2b   :  { %181 = vmatprep.subr.mxu0 %v748_v8 }
  0x2c   :  { %182 = vmatpush2.msra.mxu0 %v113_v57 }
  0x2d   :  { %183 = vmatprep.subr.mxu0 %v748_v8 }
  0x2e   :  { %184 = vmatpush2.msra.mxu0 %v112_v58 }
  0x2f   :  { %185 = vmatprep.subr.mxu0 %v748_v8 }
  0x30   :  { %186 = vmatpush2.msra.mxu0 %v111_v59 }
  0x31   :  { %187 = vmatprep.subr.mxu0 %v748_v8 }
  0x32   :  { %188 = vmatpush2.msra.mxu0 %v110_v60 }
  0x33   :  { %189 = vmatprep.subr.mxu0 %v748_v8 }
  0x34   :  { %190 = vmatpush2.msra.mxu0 %v109_v61 }
  0x35   :  { %191 = vmatprep.subr.mxu0 %v748_v8 }
  0x36   :  { %192 = vmatpush2.msra.mxu0 %v108_v62 }
  0x37   :  { %193 = vmatprep.subr.mxu0 %v748_v8 }
  0x38   :  { %194 = vmatpush2.msra.mxu0 %v107_v63 }
  0x77   :  { %v60_v1 = vpop.permute.xlu1 %59 }
  0x78   :  { %v58_v3 = vpop.permute.xlu0 %57  ;;  %v83_v13 = vsel %vm81_vm7, %v782_v0, %v60_v1  ;;  %v335_v0 = vand.u32 7, %v231_v18 }
  0x79   :  { %v82_v7 = vsel %vm81_vm7, %v790_v2, %v58_v3 }
  0x7a   :  { %vm453_vm8 = vcmp.eq.s32.totalorder %v335_v0, %v846_v40 }
  0x7b   :  { %v72_v4 = vpop.permute.xlu1 %71  ;;  %708 = vmatpush3.msk.msra.mxu1 %vm453_vm8, %v751_v44  ;;  %vm509_vm8 = vcmask 1040384  }
  0x7c   :  { %v70_v5 = vpop.permute.xlu0 %69  ;;  %v88_v9 = vsel %vm86_vm5, %v60_v1, %v72_v4  ;;  %709 = vmatprep.subr.mxu1 %v748_v8 }
  0x7d   :  { %v87_v6 = vsel %vm86_vm5, %v58_v3, %v70_v5  ;;  %710 = vmatpush3.msk.msra.mxu1 %vm452_vm9, %v751_v44 }
  0x7e   :  { %652 = vmatprep.mubr.msk.f32.mxu0 %vm118_vm6, %v87_v6  ;;  %711 = vmatprep.subr.mxu1 %v748_v8 }
  0x7f   :  { %196 = vmatmul.mubr.f32.vlgmr.msra.gmra.mxu0 %v82_v7  ;;  %v74_v10 = vpop.permute.xlu1 %73  ;;  %712 = vmatpush3.msk.msra.mxu1 %vm451_vm10, %v751_v44 }
  0x80   :  { %653 = vmatprep.mubr.msk.f32.mxu0 %vm118_vm6, %v88_v9  ;;  %v62_v11 = vpop.permute.xlu0 %61  ;;  %713 = vmatprep.subr.mxu1 %v748_v8 }
  0x81   :  { %v89_v12 = vsel %vm86_vm5, %v62_v11, %v74_v10  ;;  %v84_v14 = vsel %vm81_vm7, %v825_v26, %v62_v11  ;;  %v307_v26 = vand.u32 7, %v227_v25  ;;  %714 = vmatpush3.msk.msra.mxu1 %vm450_vm11, %v751_v44 }
  0x82   :  { %715 = vmatprep.subr.mxu1 %v748_v8 }
  0x83   :  { %201 = vmatmul.mubr.f32.gmra.mxu0 %v83_v13  ;;  %v76_v15 = vpop.permute.xlu1 %75  ;;  %vm449_vm12 = vcmp.eq.s32.totalorder %v307_v26, %v846_v40 }
  0x84   :  { %654 = vmatprep.mubr.msk.f32.mxu0 %vm118_vm6, %v89_v12  ;;  %v64_v2 = vpop.permute.xlu0 %63  ;;  %716 = vmatpush3.msk.msra.mxu1 %vm449_vm12, %v751_v44 }
  0x85   :  { %v90_v16 = vsel %vm86_vm5, %v64_v2, %v76_v15  ;;  %v85_v17 = vsel %vm81_vm7, %v829_v28, %v64_v2  ;;  %v300_v28 = vand.u32 7, %v226_v27  ;;  %717 = vmatprep.subr.mxu1 %v748_v8  ;;  %vm441_vm5 = vcmp.eq.s32.totalorder %v251_v46, %v846_v40 }
  0x86   :  { %vm439_vm7 = vcmp.eq.s32.totalorder %v237_v47, %v846_v40 }
  0x87   :  { %206 = vmatmul.mubr.f32.gmra.mxu0 %v84_v14  ;;  %vm448_vm13 = vcmp.eq.s32.totalorder %v300_v28, %v846_v40  ;;  %v590_v28 = vld [vmem:[%s1035_s2] sm:$0x1] }
  0x88   :  { %655 = vmatprep.mubr.msk.f32.mxu0 %vm118_vm6, %v90_v16  ;;  %718 = vmatpush3.msk.msra.mxu1 %vm448_vm13, %v751_v44  ;;  %vm440_vm6 = vcmp.eq.s32.totalorder %v244_v48, %v846_v40 }
  0x89   :  { %719 = vmatprep.subr.mxu1 %v748_v8 }
  0x8a   :  { %720 = vmatpush3.msk.msra.mxu1 %vm447_vm14, %v751_v44 }
  0x8b   :  { %211 = vmatmul.mubr.f32.gmra.mxu0 %v85_v17  ;;  %721 = vmatprep.subr.mxu1 %v748_v8 }
  0x8c   :  { %722 = vmatpush3.msk.msra.mxu1 %vm446_vm15, %v751_v44 }
  0x8d   :  { %723 = vmatprep.subr.mxu1 %v748_v8 }
  0x8e   :  { %724 = vmatpush3.msk.msra.mxu1 %vm445_vm0, %v751_v44 }
  0x8f   :  { %725 = vmatprep.subr.mxu1 %v748_v8 }
  0x90   :  { %726 = vmatpush3.msk.msra.mxu1 %vm444_vm1, %v751_v44 }
  0x91   :  { %727 = vmatprep.subr.mxu1 %v748_v8 }
  0x92   :  { %728 = vmatpush3.msk.msra.mxu1 %vm443_vm2, %v751_v44 }
  0x93   :  { %729 = vmatprep.subr.mxu1 %v748_v8 }
  0x94   :  { %730 = vmatpush3.msk.msra.mxu1 %vm442_vm3, %v751_v44 }
  0x95   :  { %731 = vmatprep.subr.mxu1 %v748_v8 }
  0x96   :  { %732 = vmatpush3.msk.msra.mxu1 %vm441_vm5, %v751_v44 }
  0x97   :  { %733 = vmatprep.subr.mxu1 %v748_v8 }
  0x98   :  { %734 = vmatpush3.msk.msra.mxu1 %vm440_vm6, %v751_v44 }
  0x99   :  { %735 = vmatprep.subr.mxu1 %v748_v8 }
  0x9a   :  { %736 = vmatpush3.msk.msra.mxu1 %vm439_vm7, %v751_v44 }
 0x13f   :  { %v197_v49 = vpop.f32.mrf.mxu0 }
 0x140   :  { %v496_v55 = vmul.f32 %v197_v49, %v197_v49 }
 0x141   :  { %v199_v50 = vpop.f32.mrf.mxu0 }
 0x143   :  { %v202_v51 = vpop.f32.mrf.mxu0 }
 0x144   :  { %v497_v53 = vmul.f32 %v202_v51, %v202_v51  ;;  %v487_v56 = vadd.f32 %v202_v51, %v197_v49 }
 0x145   :  { %v204_v52 = vpop.f32.mrf.mxu0 }
 0x146   :  { %v500_v59 = vadd.f32 %v497_v53, %v496_v55 }
 0x147   :  { %v207_v54 = vpop.f32.mrf.mxu0 }
 0x148   :  { %v498_v57 = vmul.f32 %v207_v54, %v207_v54  ;;  %v488_v60 = vadd.f32 %v487_v56, %v207_v54 }
 0x149   :  { %v209_v58 = vpop.f32.mrf.mxu0 }
 0x14a   :  { %v501_v40 = vadd.f32 %v500_v59, %v498_v57 }
 0x14b   :  { %v212_v61 = vpop.f32.mrf.mxu0 }
 0x14c   :  { %v489_v62 = vadd.f32 %v488_v60, %v212_v61  ;;  %v499_v63 = vmul.f32 %v212_v61, %v212_v61 }
 0x14d   :  { %v214_v1 = vpop.f32.mrf.mxu0 }
 0x14e   :  { %v490_v8 = vrot.slane %v489_v62, 4  ;;  %v502_v3 = vadd.f32 %v501_v40, %v499_v63 }
 0x150   :  { %v491_v44 = vadd.f32 %v490_v8, %v489_v62  ;;  %v503_v4 = vrot.slane %v502_v3, 4 }
 0x152   :  { %v492_v5 = vrot.slane %v491_v44, 2  ;;  %v504_v6 = vadd.f32 %v503_v4, %v502_v3 }
 0x154   :  { %v493_v7 = vadd.f32 %v492_v5, %v491_v44  ;;  %v505_v9 = vrot.slane %v504_v6, 2 }
 0x156   :  { %v494_v10 = vrot.slane %v493_v7, 1  ;;  %v506_v11 = vadd.f32 %v505_v9, %v504_v6 }
 0x158   :  { %v507_v12 = vrot.slane %v506_v11, 1  ;;  %v495_v13 = vadd.f32 %v494_v10, %v493_v7 }
 0x15a   :  { %v508_v14 = vadd.f32 %v507_v12, %v506_v11 }
 0x15c   :  { %v510_v15 = vsel %vm509_vm8, %v495_v13, %v508_v14 }
 0x15d   :  { %738 = vmatmul.mubr.f32.vlgmr.msra.gmra.mxu1 %v510_v15 }
 0x21d   :  { %v577_v2 = vpop.f32.mrf.mxu1 }
 0x21e   :  { %v582_v16 = vmul.f32 0.001953125, %v577_v2 }
 0x21f   :  { %v739_v17 = vpop.f32.mrf.mxu1 }
 0x220   :  { %v583_v18 = vmul.f32 %v582_v16, %v582_v16 }
 0x222   :  { %v585_v0 = vrot.slane %v583_v18, 7 }
 0x224   :  { %v587_v19 = vsub.f32 %v582_v16, %v585_v0 }
 0x226   :  { %v588_v20 = vadd.f32 1e-05, %v587_v19 }
 0x228   :  { %746 = vrsqrt.f32 %v588_v20 }
 0x235   :  { %v747_v25 = vpop.eup %746 }
 0x236   :  { %v598_v26 = vrot.slane %v747_v25, %v597_v24 }
 0x238   :  { %v599_v27 = vcombine.high %v598_v26, %v598_v26 }
 0x23a   :  { %v606_v29 = vrot.slane %v599_v27, %v597_v24 }
 0x23c   :  { %v608_v31 = vmul.f32 %v606_v29, %v590_v28 }
 0x23e   :  { %v610_v33 = vmul.f32 %v608_v31, %v582_v16  ;;  %v616_v35 = vrot.slane %v608_v31, %v615_v30 }
 0x240   :  { %v611_v36 = vsub.f32 %v609_v32, %v610_v33  ;;  %v618_v37 = vmul.f32 %v616_v35, %v197_v49  ;;  %v619_v38 = vmul.f32 %v616_v35, %v202_v51  ;;  %v620_v39 = vmul.f32 %v616_v35, %v207_v54 }
 0x241   :  { %v621_v41 = vmul.f32 %v616_v35, %v212_v61 }
 0x242   :  { %v626_v42 = vrot.slane %v611_v36, %v615_v30 }
 0x244   :  { %v628_v43 = vadd.f32 %v626_v42, %v618_v37  ;;  %v629_v45 = vadd.f32 %v626_v42, %v619_v38  ;;  %v630_v46 = vadd.f32 %v626_v42, %v620_v39  ;;  %v631_v47 = vadd.f32 %v626_v42, %v621_v41 }
 0x246   :  { %vm632_vm9 = vcmp.ge.f32.partialorder %v628_v43, 0.0  ;;  %vm633_vm10 = vcmp.ge.f32.partialorder %v629_v45, 0.0  ;;  %vm634_vm11 = vcmp.ge.f32.partialorder %v630_v46, 0.0  ;;  %vm635_vm12 = vcmp.ge.f32.partialorder %v631_v47, 0.0 }
 0x247   :  { %v636_v34 = vmul.f32 0.01, %v628_v43  ;;  %v637_v48 = vmul.f32 0.01, %v629_v45  ;;  %v638_v50 = vmul.f32 0.01, %v630_v46 }
 0x248   :  { %v639_v52 = vmul.f32 0.01, %v631_v47 }
 0x249   :  { %v640_v53 = vsel %vm632_vm9, %v628_v43, %v636_v34  ;;  %v641_v55 = vsel %vm633_vm10, %v629_v45, %v637_v48  ;;  %v642_v56 = vsel %vm634_vm11, %v630_v46, %v638_v50 }
 0x24a   :  { %v643_v49 = vsel %vm635_vm12, %v631_v47, %v639_v52  ;;  %644 = vst [vmem:[%s1037_s4] sm:$0xff] %v640_v53  ;;  %645 = vst [vmem:[%s1037_s4 + $0x8] sm:$0xff] %v641_v55 }
 0x24b   :  { %646 = vst [vmem:[%s1037_s4 + $0x10] sm:$0xff] %v642_v56  ;;  %647 = vst [vmem:[%s1037_s4 + $0x18] sm:$0xff] %v643_v49 }

</bundles_post_ra>
